<compile_context>
chip_gen: v7x
topology: tpu7x:2x2x1
jax: 0.10.0
libtpu: 0.0.40
codegen_flags: <defaults>
</compile_context>

<pallas_src>
import functools

import jax
import jax.numpy as jnp
from jax.experimental import pallas as pl
from jax.experimental.pallas import tpu as pltpu

N_IN = 6       # input features (native width; no wrapper-side padding)
H = 128        # hidden width
N_OUT = 3      # real output features
OUT_PAD = 8    # padded output columns: 32 B/row HBM write instead of 512 B/row

DEFAULT_BLOCK_B = 2048  # rows per grid step; ~7 MiB lane-padded VMEM per step (double-buffered
                        # x/out + intermediates + ~0.13 MiB resident weights), well inside the
                        # 32 MiB scoped-VMEM default on v5e/v6e/v7x.


def dqn_kernel(x_ref, w1_ref, b1_ref, w2_ref, b2_ref, w3_ref, b3_ref, o_ref):
    # fc1 + relu (bias folded into the f32 accumulate; K=6 contraction padded by Mosaic)
    h = jnp.dot(x_ref[...], w1_ref[...], preferred_element_type=jnp.float32) + b1_ref[...]
    h = jnp.maximum(h, 0.0)
    # fc2 + relu
    h = jnp.dot(h, w2_ref[...], preferred_element_type=jnp.float32) + b2_ref[...]
    h = jnp.maximum(h, 0.0)
    # fc3 (3 real + 5 zero-padded output columns)
    o_ref[...] = jnp.dot(h, w3_ref[...], preferred_element_type=jnp.float32) + b3_ref[...]


def _round_up(n, m):
    return ((n + m - 1) // m) * m


@functools.partial(jax.jit, static_argnames=("block_b",))
def dqn_forward(x, kparams, block_b=DEFAULT_BLOCK_B):
    """x: (B, 6) float32; kparams: pre-padded params (see prepare_kernel_params). Returns (B, 3)."""
    B = x.shape[0]
    # Batch tile: multiple of 8, capped at block_b, and sized so that any batch larger than one
    # tile produces >= 2 (balanced) grid steps so v7x can shard them across both TensorCores.
    half = _round_up(pl.cdiv(B, 2), 8)
    tb = max(8, min(block_b, half))
    grid = (pl.cdiv(B, tb),)   # ragged last block -> no batch-padding copy in the wrapper

    row = lambda i: (i, 0)     # streamed batch tiles (x / output)
    const = lambda i: (0, 0)   # weights/biases: same block every step -> VMEM-resident

    out_padded = pl.pallas_call(
        dqn_kernel,
        out_shape=jax.ShapeDtypeStruct((B, OUT_PAD), jnp.float32),
        grid=grid,
        in_specs=[
            pl.BlockSpec((tb, N_IN), row),      # x tile, native 6-wide
            pl.BlockSpec((N_IN, H), const),     # w1 (6 x 128)
            pl.BlockSpec((1, H), const),        # b1
            pl.BlockSpec((H, H), const),        # w2
            pl.BlockSpec((1, H), const),        # b2
            pl.BlockSpec((H, OUT_PAD), const),  # w3 (128 x 8, zero-padded cols)
            pl.BlockSpec((1, OUT_PAD), const),  # b3 (1 x 8, zero-padded cols)
        ],
        out_specs=pl.BlockSpec((tb, OUT_PAD), row),
        compiler_params=pltpu.CompilerParams(
            # v7x: shard batch tiles across both TensorCores; harmless on v5e/v6e.
            dimension_semantics=("parallel",),
        ),
    )(
        x,
        kparams["w1"], kparams["b1"],
        kparams["w2"], kparams["b2"],
        kparams["w3p"], kparams["b3p"],
    )
    # Cheap (B, 8) -> (B, 3) lane slice to match nn.Linear(128, 3) output exactly.
    return out_padded[:, :N_OUT]


def init_params(key):
    """Deterministic init matching PyTorch nn.Linear default:
    U(-1/sqrt(fan_in), 1/sqrt(fan_in)) for both weight and bias.
    Weights stored as (in_features, out_features) = PyTorch W.T."""
    dims = [(N_IN, H), (H, H), (H, N_OUT)]
    params = {}
    keys = jax.random.split(key, 2 * len(dims))
    for i, (fan_in, fan_out) in enumerate(dims):
        bound = 1.0 / (fan_in ** 0.5)
        w = jax.random.uniform(keys[2 * i], (fan_in, fan_out),
                               minval=-bound, maxval=bound, dtype=jnp.float32)
        b = jax.random.uniform(keys[2 * i + 1], (1, fan_out),
                               minval=-bound, maxval=bound, dtype=jnp.float32)
        params[f"w{i + 1}"] = w
        params[f"b{i + 1}"] = b
    return params


def prepare_kernel_params(params):
    """One-time zero-padding of fc3 (3 -> 8 output columns) for the kernel's output layout."""
    w3p = jnp.zeros((H, OUT_PAD), jnp.float32).at[:, :N_OUT].set(params["w3"])
    b3p = jnp.zeros((1, OUT_PAD), jnp.float32).at[:, :N_OUT].set(params["b3"])
    return {
        "w1": params["w1"], "b1": params["b1"],
        "w2": params["w2"], "b2": params["b2"],
        "w3p": w3p, "b3p": b3p,
    }


def dqn_reference(x, params):
    """Pure-JAX reference for verification (matches the PyTorch module)."""
    h = jnp.maximum(x @ params["w1"] + params["b1"], 0.0)
    h = jnp.maximum(h @ params["w2"] + params["b2"], 0.0)
    return h @ params["w3"] + params["b3"]


if __name__ == "__main__":
    key = jax.random.PRNGKey(0)
    pkey, xkey1, xkey2, xkey3 = jax.random.split(key, 4)
    params = init_params(pkey)
    kparams = prepare_kernel_params(params)

    # Tiny batch (< one sublane group): exercises the ragged single-tile path.
    B_tiny = 5
    x_tiny = jax.random.normal(xkey1, (B_tiny, N_IN), dtype=jnp.float32)
    out_tiny = jax.block_until_ready(dqn_forward(x_tiny, kparams))
    ref_tiny = dqn_reference(x_tiny, params)
    assert out_tiny.shape == (B_tiny, N_OUT), out_tiny.shape
    assert jnp.allclose(out_tiny, ref_tiny, atol=1e-5, rtol=1e-5), "tiny-batch mismatch"

    # Small exact batch (single full tile).
    B_small = 8
    x_small = jax.random.normal(xkey2, (B_small, N_IN), dtype=jnp.float32)
    out_small = jax.block_until_ready(dqn_forward(x_small, kparams))
    ref_small = dqn_reference(x_small, params)
    assert out_small.shape == (B_small, N_OUT), out_small.shape
    assert jnp.allclose(out_small, ref_small, atol=1e-5, rtol=1e-5), "small-batch mismatch"

    # Larger, non-multiple batch: 2 balanced grid steps + ragged last block.
    B_big = 2500
    x_big = jax.random.normal(xkey3, (B_big, N_IN), dtype=jnp.float32)
    out_big = jax.block_until_ready(dqn_forward(x_big, kparams))
    ref_big = dqn_reference(x_big, params)
    assert out_big.shape == (B_big, N_OUT), out_big.shape
    assert jnp.allclose(out_big, ref_big, atol=1e-5, rtol=1e-5), "large-batch mismatch"

    print("KERNEL_OK")
</pallas_src>

<mosaic_0001>
module attributes {stable_mosaic.version = 11 : i64} {
  func.func @dqn_kernel(%arg0: i32, %arg1: memref<8x6xf32, #tpu.memory_space<vmem>>, %arg2: memref<6x128xf32, #tpu.memory_space<vmem>>, %arg3: memref<1x128xf32, #tpu.memory_space<vmem>>, %arg4: memref<128x128xf32, #tpu.memory_space<vmem>>, %arg5: memref<1x128xf32, #tpu.memory_space<vmem>>, %arg6: memref<128x8xf32, #tpu.memory_space<vmem>>, %arg7: memref<1x8xf32, #tpu.memory_space<vmem>>, %arg8: memref<8x8xf32, #tpu.memory_space<vmem>>) attributes {dimension_semantics = [#tpu.dimension_semantics<parallel>], iteration_bounds = array<i64: 1>, scalar_prefetch = 0 : i64, scratch_operands = 0 : i64, tpu.core_type = #tpu.core_type<tc>, window_params = [{transform_indices = @transform_0, window_bounds = array<i64: 8, 6>}, {pipeline_mode = #tpu.pipeline_mode<synchronous>, transform_indices = @transform_1, window_bounds = array<i64: 6, 128>}, {pipeline_mode = #tpu.pipeline_mode<synchronous>, transform_indices = @transform_2, window_bounds = array<i64: 1, 128>}, {pipeline_mode = #tpu.pipeline_mode<synchronous>, transform_indices = @transform_3, window_bounds = array<i64: 128, 128>}, {pipeline_mode = #tpu.pipeline_mode<synchronous>, transform_indices = @transform_4, window_bounds = array<i64: 1, 128>}, {pipeline_mode = #tpu.pipeline_mode<synchronous>, transform_indices = @transform_5, window_bounds = array<i64: 128, 8>}, {pipeline_mode = #tpu.pipeline_mode<synchronous>, transform_indices = @transform_6, window_bounds = array<i64: 1, 8>}, {transform_indices = @transform_7, window_bounds = array<i64: 8, 8>}]} {
    %c0 = arith.constant 0 : index
    %c0_0 = arith.constant 0 : index
    %0 = vector.load %arg1[%c0, %c0_0] : memref<8x6xf32, #tpu.memory_space<vmem>>, vector<8x6xf32>
    %c0_1 = arith.constant 0 : index
    %c0_2 = arith.constant 0 : index
    %1 = vector.load %arg2[%c0_1, %c0_2] : memref<6x128xf32, #tpu.memory_space<vmem>>, vector<6x128xf32>
    %cst = arith.constant dense<0.000000e+00> : vector<8x128xf32>
    %2 = tpu.matmul %0, %1, %cst {dimension_numbers = #tpu.dot_dimension_numbers<[1], [0], [0], [1], [0, 0, 1, 1], [], []>} : vector<8x6xf32>, vector<6x128xf32>, vector<8x128xf32> -> vector<8x128xf32>
    %c0_3 = arith.constant 0 : index
    %c0_4 = arith.constant 0 : index
    %3 = vector.load %arg3[%c0_3, %c0_4] : memref<1x128xf32, #tpu.memory_space<vmem>>, vector<1x128xf32>
    %4 = vector.broadcast %3 : vector<1x128xf32> to vector<8x128xf32>
    %5 = arith.addf %2, %4 : vector<8x128xf32>
    %cst_5 = arith.constant 0.000000e+00 : f32
    %6 = vector.broadcast %cst_5 : f32 to vector<8x128xf32>
    %7 = arith.maximumf %5, %6 : vector<8x128xf32>
    %c0_6 = arith.constant 0 : index
    %c0_7 = arith.constant 0 : index
    %8 = vector.load %arg4[%c0_6, %c0_7] : memref<128x128xf32, #tpu.memory_space<vmem>>, vector<128x128xf32>
    %cst_8 = arith.constant dense<0.000000e+00> : vector<8x128xf32>
    %9 = tpu.matmul %7, %8, %cst_8 {dimension_numbers = #tpu.dot_dimension_numbers<[1], [0], [0], [1], [0, 0, 1, 1], [], []>} : vector<8x128xf32>, vector<128x128xf32>, vector<8x128xf32> -> vector<8x128xf32>
    %c0_9 = arith.constant 0 : index
    %c0_10 = arith.constant 0 : index
    %10 = vector.load %arg5[%c0_9, %c0_10] : memref<1x128xf32, #tpu.memory_space<vmem>>, vector<1x128xf32>
    %11 = vector.broadcast %10 : vector<1x128xf32> to vector<8x128xf32>
    %12 = arith.addf %9, %11 : vector<8x128xf32>
    %cst_11 = arith.constant 0.000000e+00 : f32
    %13 = vector.broadcast %cst_11 : f32 to vector<8x128xf32>
    %14 = arith.maximumf %12, %13 : vector<8x128xf32>
    %c0_12 = arith.constant 0 : index
    %c0_13 = arith.constant 0 : index
    %15 = vector.load %arg6[%c0_12, %c0_13] : memref<128x8xf32, #tpu.memory_space<vmem>>, vector<128x8xf32>
    %cst_14 = arith.constant dense<0.000000e+00> : vector<8x8xf32>
    %16 = tpu.matmul %14, %15, %cst_14 {dimension_numbers = #tpu.dot_dimension_numbers<[1], [0], [0], [1], [0, 0, 1, 1], [], []>} : vector<8x128xf32>, vector<128x8xf32>, vector<8x8xf32> -> vector<8x8xf32>
    %c0_15 = arith.constant 0 : index
    %c0_16 = arith.constant 0 : index
    %17 = vector.load %arg7[%c0_15, %c0_16] : memref<1x8xf32, #tpu.memory_space<vmem>>, vector<1x8xf32>
    %18 = vector.broadcast %17 : vector<1x8xf32> to vector<8x8xf32>
    %19 = arith.addf %16, %18 : vector<8x8xf32>
    %c0_17 = arith.constant 0 : index
    %c0_18 = arith.constant 0 : index
    %20 = vector.load %arg8[%c0_17, %c0_18] : memref<8x8xf32, #tpu.memory_space<vmem>>, vector<8x8xf32>
    tpu.vector_store %arg8[%c0_17, %c0_18], %19 {strides = array<i32>} : memref<8x8xf32, #tpu.memory_space<vmem>>, vector<8x8xf32>,
    return
  }
  func.func @transform_0(%arg0: i32) -> (i32, i32) {
    %c0_i32 = arith.constant 0 : i32
    %c0_i32_0 = arith.constant 0 : i32
    return %arg0, %c0_i32 : i32, i32
  }
  func.func @transform_1(%arg0: i32) -> (i32, i32) {
    %c0_i32 = arith.constant 0 : i32
    %c0_i32_0 = arith.constant 0 : i32
    %c0_i32_1 = arith.constant 0 : i32
    return %c0_i32, %c0_i32_0 : i32, i32
  }
  func.func @transform_2(%arg0: i32) -> (i32, i32) {
    %c0_i32 = arith.constant 0 : i32
    %c0_i32_0 = arith.constant 0 : i32
    %c0_i32_1 = arith.constant 0 : i32
    return %c0_i32, %c0_i32_0 : i32, i32
  }
  func.func @transform_3(%arg0: i32) -> (i32, i32) {
    %c0_i32 = arith.constant 0 : i32
    %c0_i32_0 = arith.constant 0 : i32
    %c0_i32_1 = arith.constant 0 : i32
    return %c0_i32, %c0_i32_0 : i32, i32
  }
  func.func @transform_4(%arg0: i32) -> (i32, i32) {
    %c0_i32 = arith.constant 0 : i32
    %c0_i32_0 = arith.constant 0 : i32
    %c0_i32_1 = arith.constant 0 : i32
    return %c0_i32, %c0_i32_0 : i32, i32
  }
  func.func @transform_5(%arg0: i32) -> (i32, i32) {
    %c0_i32 = arith.constant 0 : i32
    %c0_i32_0 = arith.constant 0 : i32
    %c0_i32_1 = arith.constant 0 : i32
    return %c0_i32, %c0_i32_0 : i32, i32
  }
  func.func @transform_6(%arg0: i32) -> (i32, i32) {
    %c0_i32 = arith.constant 0 : i32
    %c0_i32_0 = arith.constant 0 : i32
    %c0_i32_1 = arith.constant 0 : i32
    return %c0_i32, %c0_i32_0 : i32, i32
  }
  func.func @transform_7(%arg0: i32) -> (i32, i32) {
    %c0_i32 = arith.constant 0 : i32
    %c0_i32_0 = arith.constant 0 : i32
    return %arg0, %c0_i32 : i32, i32
  }
}

</mosaic_0001>

<bundles_post_ra>
// kernel: dqn_forward.1
= control target key start
LH: loop header
LB: loop body
LE: loop exit
PB: predicated region body
PF: predicated region fallthrough
CT: control target
= control target key end

     0   :  { %vm39_vm0 = vcmask 1045504   ;;  %vm35_vm1 = vcmask 48128   ;;  %v474_v0 = vmov 0.0   ;;  %vm475_vm2 = vmmov 0   ;;  %s647_s1 = inlined_call_operand.vmem [shape: f32[6,128], index: 1, kind: input, shape index: {}]   ;;  %s648_s0 = inlined_call_operand.vmem [shape: f32[5,6], index: 0, kind: input, shape index: {}]   ;;  %s649_s3 = inlined_call_operand.vmem [shape: f32[128,128], index: 3, kind: input, shape index: {}]   ;;  %s650_s5 = inlined_call_operand.vmem [shape: f32[128,8], index: 5, kind: input, shape index: {}]   ;;  %s651_s2 = inlined_call_operand.vmem [shape: f32[1,128], index: 2, kind: input, shape index: {}]   ;;  %s652_s4 = inlined_call_operand.vmem [shape: f32[1,128], index: 4, kind: input, shape index: {}]   ;;  %s653_s6 = inlined_call_operand.vmem [shape: f32[1,8], index: 6, kind: input, shape index: {}]   ;;  %s654_s7 = inlined_call_operand.vmem [shape: f32[5,8], index: 7, kind: output, shape index: {}]  }
   0x1   :  { %348 = vmatprep.subr.mxu0 %v474_v0  ;;  %v27_v1 = vld [vmem:[%s647_s1] sm:$0x3f]  ;;  %350 = vmatprep.mubr.msk.f32.mxu0 %vm475_vm2, %v474_v0  ;;  %v476_v4 = vmov 0.0|0.0   ;;  %v115_v5 = vld [vmem:[%s649_s3 + $0x8] sm:$0xff]  ;;  %v116_v6 = vld [vmem:[%s649_s3 + $0x10] sm:$0xff]  ;;  %vm301_vm3 = vcmask 64512  }
   0x2   :  { %v26_v2 = vld [vmem:[%s648_s0] sm:$0xff]  ;;  %349 = vmatpush3.msk.msra.mxu0 %vm39_vm0, %v27_v1  ;;  %423 = vmatprep.subr.bf16.mxu1 %v476_v4  ;;  %v117_v7 = vld [vmem:[%s649_s3 + $0x18] sm:$0xff]  ;;  %v119_v11 = vld [vmem:[%s649_s3 + $0x28] sm:$0xff] }
   0x3   :  { %v114_v3 = vld [vmem:[%s649_s3] sm:$0xff]  ;;  %351 = vmatmul.mubr.msk.f32.vlgmr.msra.gmra.mrb[0].mxu0 %vm35_vm1, %v26_v2  ;;  %385 = vmatprep.mubr.msk.f32.mxu1 %vm475_vm2, %v474_v0  ;;  %v427_v9 = vpack.c.bf16 %v117_v7, %v116_v6  ;;  %v120_v13 = vld [vmem:[%s649_s3 + $0x30] sm:$0xff]  ;;  %v121_v14 = vld [vmem:[%s649_s3 + $0x38] sm:$0xff] }
   0x4   :  { %v424_v8 = vpack.c.bf16 %v115_v5, %v114_v3  ;;  %447 = vmatprep.subr.bf16.mxu0 %v476_v4  ;;  %420 = vmatprep.mubr.msk.f32.mxu0 %vm475_vm2, %v474_v0  ;;  %v118_v10 = vld [vmem:[%s649_s3 + $0x20] sm:$0xff]  ;;  %v433_v15 = vpack.c.bf16 %v121_v14, %v120_v13  ;;  %v123_v17 = vld [vmem:[%s649_s3 + $0x48] sm:$0xff]  ;;  %v124_v19 = vld [vmem:[%s649_s3 + $0x50] sm:$0xff] }
   0x5   :  { %v430_v12 = vpack.c.bf16 %v119_v11, %v118_v10  ;;  %v122_v16 = vld [vmem:[%s649_s3 + $0x40] sm:$0xff]  ;;  %v125_v20 = vld [vmem:[%s649_s3 + $0x58] sm:$0xff]  ;;  %v127_v23 = vld [vmem:[%s649_s3 + $0x68] sm:$0xff] }
   0x6   :  { %425 = vmatpush3.bf16.msra.mxu1 %v424_v8  ;;  %v436_v18 = vpack.c.bf16 %v123_v17, %v122_v16  ;;  %v439_v21 = vpack.c.bf16 %v125_v20, %v124_v19  ;;  %v126_v22 = vld [vmem:[%s649_s3 + $0x60] sm:$0xff]  ;;  %v128_v25 = vld [vmem:[%s649_s3 + $0x70] sm:$0xff]  ;;  %v129_v26 = vld [vmem:[%s649_s3 + $0x78] sm:$0xff] }
   0x7   :  { %426 = vmatprep.subr.bf16.mxu1 %v476_v4  ;;  %v442_v24 = vpack.c.bf16 %v127_v23, %v126_v22  ;;  %v445_v27 = vpack.c.bf16 %v129_v26, %v128_v25  ;;  %v208_v28 = vld [vmem:[%s650_s5] sm:$0xff]  ;;  %v209_v29 = vld [vmem:[%s650_s5 + $0x8] sm:$0xff]  ;;  %v210_v30 = vld [vmem:[%s650_s5 + $0x10] sm:$0xff] }
   0x8   :  { %v448_v31 = vpack.c.bf16 %v209_v29, %v208_v28  ;;  %v211_v32 = vld [vmem:[%s650_s5 + $0x18] sm:$0xff]  ;;  %v212_v34 = vld [vmem:[%s650_s5 + $0x20] sm:$0xff]  ;;  %v213_v35 = vld [vmem:[%s650_s5 + $0x28] sm:$0xff] }
   0x9   :  { %v451_v33 = vpack.c.bf16 %v211_v32, %v210_v30  ;;  %v454_v36 = vpack.c.bf16 %v213_v35, %v212_v34  ;;  %v214_v37 = vld [vmem:[%s650_s5 + $0x30] sm:$0xff]  ;;  %v215_v38 = vld [vmem:[%s650_s5 + $0x38] sm:$0xff]  ;;  %v216_v40 = vld [vmem:[%s650_s5 + $0x40] sm:$0xff] }
   0xa   :  { %428 = vmatpush3.bf16.msra.mxu1 %v427_v9  ;;  %449 = vmatpush3.bf16.msra.mxu0 %v448_v31  ;;  %v457_v39 = vpack.c.bf16 %v215_v38, %v214_v37  ;;  %v217_v41 = vld [vmem:[%s650_s5 + $0x48] sm:$0xff]  ;;  %v218_v43 = vld [vmem:[%s650_s5 + $0x50] sm:$0xff]  ;;  %v219_v44 = vld [vmem:[%s650_s5 + $0x58] sm:$0xff] }
   0xb   :  { %429 = vmatprep.subr.bf16.mxu1 %v476_v4  ;;  %450 = vmatprep.subr.bf16.mxu0 %v476_v4  ;;  %v460_v42 = vpack.c.bf16 %v217_v41, %v216_v40  ;;  %v463_v45 = vpack.c.bf16 %v219_v44, %v218_v43  ;;  %v220_v46 = vld [vmem:[%s650_s5 + $0x60] sm:$0xff]  ;;  %v221_v47 = vld [vmem:[%s650_s5 + $0x68] sm:$0xff]  ;;  %v222_v54 = vld [vmem:[%s650_s5 + $0x70] sm:$0xff] }
   0xc   :  { %v466_v48 = vpack.c.bf16 %v221_v47, %v220_v46  ;;  %v307_v49 = vld [vmem:[%s651_s2] ss:$0 sm:$0xff]  ;;  %v223_v55 = vld [vmem:[%s650_s5 + $0x78] sm:$0xff] }
   0xd   :  { %v469_v56 = vpack.c.bf16 %v223_v55, %v222_v54  ;;  %v310_v57 = vld [vmem:[%s652_s4] ss:$0 sm:$0xff] }
   0xe   :  { %431 = vmatpush3.bf16.msra.mxu1 %v430_v12  ;;  %452 = vmatpush3.bf16.msra.mxu0 %v451_v33  ;;  %v311_v62 = vld [vmem:[%s653_s6] ss:$0 sm:$0xff] }
   0xf   :  { %432 = vmatprep.subr.bf16.mxu1 %v476_v4  ;;  %453 = vmatprep.subr.bf16.mxu0 %v476_v4 }
  0x12   :  { %434 = vmatpush3.bf16.msra.mxu1 %v433_v15  ;;  %455 = vmatpush3.bf16.msra.mxu0 %v454_v36 }
  0x13   :  { %435 = vmatprep.subr.bf16.mxu1 %v476_v4  ;;  %456 = vmatprep.subr.bf16.mxu0 %v476_v4 }
  0x16   :  { %437 = vmatpush3.bf16.msra.mxu1 %v436_v18  ;;  %458 = vmatpush3.bf16.msra.mxu0 %v457_v39 }
  0x17   :  { %438 = vmatprep.subr.bf16.mxu1 %v476_v4  ;;  %459 = vmatprep.subr.bf16.mxu0 %v476_v4 }
  0x1a   :  { %440 = vmatpush3.bf16.msra.mxu1 %v439_v21  ;;  %461 = vmatpush3.bf16.msra.mxu0 %v460_v42 }
  0x1b   :  { %441 = vmatprep.subr.bf16.mxu1 %v476_v4  ;;  %462 = vmatprep.subr.bf16.mxu0 %v476_v4 }
  0x1e   :  { %443 = vmatpush3.bf16.msra.mxu1 %v442_v24  ;;  %464 = vmatpush3.bf16.msra.mxu0 %v463_v45 }
  0x1f   :  { %444 = vmatprep.subr.bf16.mxu1 %v476_v4  ;;  %465 = vmatprep.subr.bf16.mxu0 %v476_v4 }
  0x22   :  { %446 = vmatpush3.bf16.msra.mxu1 %v445_v27  ;;  %467 = vmatpush3.bf16.msra.mxu0 %v466_v48 }
  0x23   :  { %468 = vmatprep.subr.bf16.mxu0 %v476_v4 }
  0x26   :  { %470 = vmatpush3.bf16.msra.mxu0 %v469_v56 }
  0xd6   :  { %v109_v50 = vpop.f32.mrb[0].mxu0 }
  0xd7   :  { %v110_v51 = vadd.f32 %v307_v49, %v109_v50  ;;  %v352_v52 = vpop.f32.mrb[1].mxu0 }
  0xd9   :  { %v113_v53 = vmax.f32 %v110_v51, 0.0 }
  0xdb   :  { %386 = vmatmul.mubr.f32.vlgmr.msra.gmra.mrb[0].mxu1 %v113_v53 }
 0x1ae   :  { %v203_v58 = vpop.f32.mrb[0].mxu1 }
 0x1af   :  { %v204_v59 = vadd.f32 %v310_v57, %v203_v58  ;;  %v387_v60 = vpop.f32.mrb[1].mxu1 }
 0x1b1   :  { %v207_v61 = vmax.f32 %v204_v59, 0.0 }
 0x1b3   :  { %421 = vmatmul.mubr.f32.vlgmr.msra.gmra.mrb[2].mxu0 %v207_v61 }
 0x286   :  { %v297_v63 = vpop.f32.mrb[2].mxu0 }
 0x287   :  { %v298_v0 = vadd.f32 %v311_v62, %v297_v63  ;;  %v422_v1 = vpop.f32.mrb[3].mxu0 }
 0x289   :  { %302 = vst.msk [vmem:[%s654_s7] sm:$0xff] %vm301_vm3, %v298_v0 }

</bundles_post_ra>
